<compile_context>
chip_gen: v7x
topology: tpu7x:2x2x1
jax: 0.10.0
libtpu: 0.0.40
codegen_flags: <defaults>
</compile_context>

<pallas_src>
import functools

import numpy as np
import jax
import jax.numpy as jnp
from jax.experimental import pallas as pl
from jax.experimental.pallas import tpu as pltpu


# ---------------------------------------------------------------------------
# pltpu.roll convention probe (runs once, outside of any jit).
# ---------------------------------------------------------------------------
@functools.lru_cache(maxsize=None)
def _roll_convention():
    """Detect the lane-rotation convention of pltpu.roll with a tiny probe kernel.

    Returns:
      +1  pltpu.roll(x, s) moves data to HIGHER lane indices (jnp.roll convention);
          a left-shift by s is then pltpu.roll(x, L - s).
      -1  pltpu.roll(x, s) moves data to LOWER lane indices; left-shift by s is
          pltpu.roll(x, s).
       0  pltpu.roll unusable -> fall back to concat-based lane shifts.
    """
    try:
        def _probe(x_ref, o_ref):
            o_ref[...] = pltpu.roll(x_ref[...], 1, axis=1)

        with jax.ensure_compile_time_eval():
            x = jnp.arange(8 * 128, dtype=jnp.float32).reshape(8, 128)
            y = pl.pallas_call(
                _probe, out_shape=jax.ShapeDtypeStruct((8, 128), jnp.float32)
            )(x)
            v = int(jax.device_get(y[0, 0]))
        if v == 127:
            return 1
        if v == 1:
            return -1
    except Exception:  # robustness: any failure -> concat-based fallback
        pass
    return 0


def _make_roll_left(conv):
    """roll_left(x, s)[..., i] == x[..., (i + s) % L] along the last (lane) axis."""
    if conv == 0:
        def roll_left(x, s):
            s = s % x.shape[-1]
            if s == 0:
                return x
            return jnp.concatenate([x[..., s:], x[..., :s]], axis=-1)
    else:
        def roll_left(x, s):
            L = x.shape[-1]
            s = s % L
            if s == 0:
                return x
            amt = (L - s) if conv == 1 else s
            return pltpu.roll(x, amt, axis=x.ndim - 1)
    return roll_left


# ---------------------------------------------------------------------------
# Static layout / schedule construction.
# ---------------------------------------------------------------------------
def _choose_band_packing(R, Wo):
    """Pick k = number of bands packed per kernel row (k must divide R).

    Preference: smallest k with (k*Wo) % 128 == 0 (lane-dense input AND output
    rows, unmasked stores), else smallest k with k*Wo >= 128, else pack
    everything into one row for tiny problems.  Rows capped at 32768 lanes.
    """
    max_lanes = 32768
    kmax = min(R, max(1, max_lanes // (4 * Wo)))
    best_ge_128 = None
    for k in range(1, kmax + 1):
        if R % k:
            continue
        if (Wo * k) % 128 == 0:
            return k
        if best_ge_128 is None and Wo * k >= 128:
            best_ge_128 = k
    if best_ge_128 is not None:
        return best_ge_128
    return kmax if R % kmax == 0 else 1


def _build_compaction_schedule(k, Wo):
    """Static lane-compaction schedule for one kernel row of k packed bands.

    After the 2x2 max/select, the pooled value for (band j, column i) sits at
    lane 4*Wo*j + 2*i.  The schedule moves it to lane Wo*j + i using
    ceil(log2(Wo)) within-band stages (even-lane compaction) followed by
    ceil(log2(k)) cross-band stages (closing the 3*Wo inter-band gaps).  Each
    stage is:   x = where(mask, roll_left(x, shift), x)   with a purely
    lane-dependent mask.  The schedule is verified by simulation below.
    """
    L = 4 * Wo * k
    lane = np.arange(L)
    shifts, masks = [], []

    t = 0
    while (1 << t) < Wo:                      # phase 1: within-band even-lane compaction
        s = 1 << t
        q = lane % (4 * Wo)
        masks.append(((q & s) != 0) & ((q & (2 * s)) == 0))
        shifts.append(s)
        t += 1

    t = 0
    while (1 << t) < k:                       # phase 2: close the gaps between bands
        half = Wo * (1 << t)
        full = Wo * (1 << (t + 1))
        u = lane % (4 * full)
        masks.append((u >= half) & (u < full))
        shifts.append(3 * Wo * (1 << t))
        t += 1

    # Setup-time verification of the full schedule (runs on plain numpy indices).
    content = lane.copy()
    for s, msk in zip(shifts, masks):
        content = np.where(msk, np.roll(content, -s), content)
    j = np.arange(k * Wo)
    expect = 4 * Wo * (j // Wo) + 2 * (j % Wo)
    assert np.array_equal(content[: k * Wo], expect), "internal error: bad compaction schedule"

    if masks:
        mask_mat = np.stack(masks).astype(np.int32)
    else:
        mask_mat = np.zeros((1, L), np.int32)  # dummy (unused) when no stages
    return shifts, mask_mat


# ---------------------------------------------------------------------------
# Kernel.
# ---------------------------------------------------------------------------
def _make_kernel(shifts, band_w, out_w, roll_left):
    """band_w = 2*Wo (width of one image row inside a band); out_w = k*Wo."""
    # TODO(synk): for bf16 inputs, pack mean+variance into one u32 container
    # (pltpu.pack_elementwise) so the cascade moves both with one roll/select
    # per stage; kept separate here for dtype-generic robustness.

    def kernel(masks_ref, mean_ref, var_ref, out_mean_ref, out_var_ref):
        m = mean_ref[...]
        v = var_ref[...]

        # Horizontal 2->1: compare each lane with its right neighbour.
        # Strict '>' so the LEFT element wins ties (matches PyTorch / argmax).
        m_r = roll_left(m, 1)
        v_r = roll_left(v, 1)
        th = m_r > m
        hm = jnp.where(th, m_r, m)
        hv = jnp.where(th, v_r, v)

        # Vertical 2->1: inside each band the bottom image row sits band_w lanes
        # to the right of the top row.  Strict '>' so the TOP row wins ties.
        hm_b = roll_left(hm, band_w)
        hv_b = roll_left(hv, band_w)
        tv = hm_b > hm
        pm = jnp.where(tv, hm_b, hm)
        pv = jnp.where(tv, hv_b, hv)

        # Static compaction cascade: gather the pooled values (even lanes of each
        # band's top half) into the dense first out_w lanes.  Masks are (1, L)
        # rows broadcast by jnp.where; shifts/masks are compile-time constants.
        if shifts:
            masks = masks_ref[...]
            for i, s in enumerate(shifts):
                cond = masks[i:i + 1, :] != 0
                pm = jnp.where(cond, roll_left(pm, s), pm)
                pv = jnp.where(cond, roll_left(pv, s), pv)

        out_mean_ref[...] = pm[:, :out_w]
        out_var_ref[...] = pv[:, :out_w]

    return kernel


# ---------------------------------------------------------------------------
# Wrapper.
# ---------------------------------------------------------------------------
def maxpool2d_varprop(inputs_mean, inputs_variance, kernel_size=2, stride=2, padding=0):
    """Matches varprop.MaxPool2d(kernel_size=2, stride=2, padding).forward."""
    assert kernel_size == 2 and stride == 2, "kernel only implements the module defaults (2, 2)"
    N, C, H, W = inputs_mean.shape

    if padding:
        # F.pad(x, (p, p)) pads only the last (W) dimension with zeros.
        # TODO(synk): fold the pad (and the odd-H/W crop below) into the kernel's
        # index_map + in-kernel masking to avoid the extra HBM pass XLA inserts here.
        pad = ((0, 0), (0, 0), (0, 0), (padding, padding))
        inputs_mean = jnp.pad(inputs_mean, pad)
        inputs_variance = jnp.pad(inputs_variance, pad)
        W = W + 2 * padding

    # Floor-mode pooling: drop trailing odd row/col (PyTorch ceil_mode=False).
    Ho, Wo = H // 2, W // 2
    assert Ho >= 1 and Wo >= 1, "input too small for 2x2 pooling"
    m = inputs_mean[:, :, : 2 * Ho, : 2 * Wo]
    v = inputs_variance[:, :, : 2 * Ho, : 2 * Wo]

    # Copy-free band view (for even H/W, padding == 0): one band = the two image
    # rows of a pooling row = 4*Wo contiguous elements; pack k bands per kernel
    # row so the OUTPUT row width k*Wo is lane-dense.
    R = N * C * Ho
    k = _choose_band_packing(R, Wo)
    Rk = R // k
    L_in = 4 * Wo * k
    L_out = Wo * k
    m2 = m.reshape(Rk, L_in)
    v2 = v.reshape(Rk, L_in)

    shifts, mask_mat = _build_compaction_schedule(k, Wo)
    masks = jnp.asarray(mask_mat)                       # (S, L_in) int32, tiny, resident

    # Row blocking: ~2 MiB of input per tensor per grid step (safe on v5e/v6e/v7x
    # with the explicit VMEM limit below), balanced so the tail step isn't tiny.
    itemsize = jnp.dtype(m2.dtype).itemsize
    row_bytes = L_in * itemsize
    target_block_bytes = 2 << 20
    tr = max(8, (target_block_bytes // row_bytes) // 8 * 8)
    if tr >= Rk:
        tr = Rk                                # full extent (always layout-legal)
    else:
        nb = (Rk + tr - 1) // tr
        tr = (Rk + nb - 1) // nb
        tr = max(8, ((tr + 7) // 8) * 8)       # keep sublane dim a multiple of 8
    grid = ((Rk + tr - 1) // tr,)

    mask_spec = pl.BlockSpec(masks.shape, lambda r: (0, 0))   # same block every step
    in_spec = pl.BlockSpec((tr, L_in), lambda r: (r, 0))
    out_spec = pl.BlockSpec((tr, L_out), lambda r: (r, 0))

    n_stages = len(shifts)
    bytes_accessed = (m2.size + v2.size + 2 * Rk * L_out) * itemsize + int(masks.size) * 4
    flops = (8 + 3 * n_stages) * Rk * L_in
    cost = pl.CostEstimate(flops=int(flops), transcendentals=0,
                           bytes_accessed=int(bytes_accessed))

    kernel = _make_kernel(shifts, 2 * Wo, L_out, _make_roll_left(_roll_convention()))

    # TODO(synk): on v7x, pltpu.CORE_PARALLEL on this axis (or a core_map) would
    # shard the row grid across both TensorCores; kept "parallel" for portability.
    out_mean, out_var = pl.pallas_call(
        kernel,
        out_shape=(
            jax.ShapeDtypeStruct((Rk, L_out), m2.dtype),
            jax.ShapeDtypeStruct((Rk, L_out), v2.dtype),
        ),
        grid=grid,
        in_specs=[mask_spec, in_spec, in_spec],
        out_specs=(out_spec, out_spec),
        compiler_params=pltpu.CompilerParams(
            dimension_semantics=("parallel",),
            vmem_limit_bytes=40 * 1024 * 1024,
        ),
        cost_estimate=cost,
    )(masks, m2, v2)

    # Copy-free reshape back to pooled NCHW.
    return out_mean.reshape(N, C, Ho, Wo), out_var.reshape(N, C, Ho, Wo)


# ---------------------------------------------------------------------------
# Pure-JAX reference of the PyTorch module (padding=0 default).
# ---------------------------------------------------------------------------
def _reference(inputs_mean, inputs_variance):
    N, C, H, W = inputs_mean.shape
    Ho, Wo = H // 2, W // 2
    mw = inputs_mean[:, :, : 2 * Ho, : 2 * Wo].reshape(N, C, Ho, 2, Wo, 2)
    vw = inputs_variance[:, :, : 2 * Ho, : 2 * Wo].reshape(N, C, Ho, 2, Wo, 2)
    mw = mw.transpose(0, 1, 2, 4, 3, 5).reshape(N, C, Ho, Wo, 4)
    vw = vw.transpose(0, 1, 2, 4, 3, 5).reshape(N, C, Ho, Wo, 4)
    idx = jnp.argmax(mw, axis=-1)
    om = jnp.max(mw, axis=-1)
    ov = jnp.take_along_axis(vw, idx[..., None], axis=-1)[..., 0]
    return om, ov


if __name__ == "__main__":
    key = jax.random.PRNGKey(0)
    k1, k2 = jax.random.split(key)
    N, C, H, W = 2, 4, 16, 16
    inputs_mean = jax.random.normal(k1, (N, C, H, W), dtype=jnp.float32)
    inputs_variance = jax.random.uniform(k2, (N, C, H, W), dtype=jnp.float32) + 0.1

    out_mean, out_var = maxpool2d_varprop(inputs_mean, inputs_variance)
    jax.block_until_ready((out_mean, out_var))

    ref_mean, ref_var = _reference(inputs_mean, inputs_variance)
    assert out_mean.shape == (N, C, H // 2, W // 2)
    assert out_var.shape == (N, C, H // 2, W // 2)
    assert jnp.allclose(out_mean, ref_mean, atol=1e-6, rtol=1e-6)
    assert jnp.allclose(out_var, ref_var, atol=1e-6, rtol=1e-6)

    print("KERNEL_OK")
</pallas_src>

<mosaic_0001>
module attributes {stable_mosaic.version = 11 : i64} {
  func.func @_probe(%arg0: memref<8x128xf32, #tpu.memory_space<vmem>>, %arg1: memref<8x128xf32, #tpu.memory_space<vmem>>) attributes {dimension_semantics = [], scalar_prefetch = 0 : i64, scratch_operands = 0 : i64, tpu.core_type = #tpu.core_type<tc>} {
    %c0 = arith.constant 0 : index
    %c0_0 = arith.constant 0 : index
    %0 = vector.load %arg0[%c0, %c0_0] : memref<8x128xf32, #tpu.memory_space<vmem>>, vector<8x128xf32>
    %c1_i32 = arith.constant 1 : i32
    %1 = tpu.dynamic_rotate %0 by %c1_i32 dim 1 : vector<8x128xf32>, i32 -> vector<8x128xf32>
    %c0_1 = arith.constant 0 : index
    %c0_2 = arith.constant 0 : index
    %2 = vector.load %arg1[%c0_1, %c0_2] : memref<8x128xf32, #tpu.memory_space<vmem>>, vector<8x128xf32>
    tpu.vector_store %arg1[%c0_1, %c0_2], %1 {strides = array<i32>} : memref<8x128xf32, #tpu.memory_space<vmem>>, vector<8x128xf32>,
    return
  }
}

module attributes {stable_mosaic.version = 11 : i64} {
  func.func @kernel(%arg0: i32, %arg1: memref<7x512xi32, #tpu.memory_space<vmem>>, %arg2: memref<4x512xf32, #tpu.memory_space<vmem>>, %arg3: memref<4x512xf32, #tpu.memory_space<vmem>>, %arg4: memref<4x128xf32, #tpu.memory_space<vmem>>, %arg5: memref<4x128xf32, #tpu.memory_space<vmem>>) attributes {dimension_semantics = [#tpu.dimension_semantics<parallel>], iteration_bounds = array<i64: 1>, scalar_prefetch = 0 : i64, scratch_operands = 0 : i64, tpu.core_type = #tpu.core_type<tc>, window_params = [{pipeline_mode = #tpu.pipeline_mode<synchronous>, transform_indices = @transform_0, window_bounds = array<i64: 7, 512>}, {transform_indices = @transform_1, window_bounds = array<i64: 4, 512>}, {transform_indices = @transform_2, window_bounds = array<i64: 4, 512>}, {transform_indices = @transform_3, window_bounds = array<i64: 4, 128>}, {transform_indices = @transform_4, window_bounds = array<i64: 4, 128>}]} {
    %c0 = arith.constant 0 : index
    %c0_0 = arith.constant 0 : index
    %0 = vector.load %arg2[%c0, %c0_0] : memref<4x512xf32, #tpu.memory_space<vmem>>, vector<4x512xf32>
    %c0_1 = arith.constant 0 : index
    %c0_2 = arith.constant 0 : index
    %1 = vector.load %arg3[%c0_1, %c0_2] : memref<4x512xf32, #tpu.memory_space<vmem>>, vector<4x512xf32>
    %2 = vector.extract_strided_slice %0 {offsets = [0, 1], sizes = [4, 511], strides = [1, 1]} : vector<4x512xf32> to vector<4x511xf32>
    %3 = vector.extract_strided_slice %0 {offsets = [0, 0], sizes = [4, 1], strides = [1, 1]} : vector<4x512xf32> to vector<4x1xf32>
    %4 = tpu.concatenate %2, %3 in 1 : vector<4x511xf32>, vector<4x1xf32> -> vector<4x512xf32>
    %5 = vector.extract_strided_slice %1 {offsets = [0, 1], sizes = [4, 511], strides = [1, 1]} : vector<4x512xf32> to vector<4x511xf32>
    %6 = vector.extract_strided_slice %1 {offsets = [0, 0], sizes = [4, 1], strides = [1, 1]} : vector<4x512xf32> to vector<4x1xf32>
    %7 = tpu.concatenate %5, %6 in 1 : vector<4x511xf32>, vector<4x1xf32> -> vector<4x512xf32>
    %8 = arith.cmpf ogt, %4, %0 : vector<4x512xf32>
    %9 = arith.select %8, %4, %0 : vector<4x512xi1>, vector<4x512xf32>
    %10 = arith.select %8, %7, %1 : vector<4x512xi1>, vector<4x512xf32>
    %11 = vector.extract_strided_slice %9 {offsets = [0, 16], sizes = [4, 496], strides = [1, 1]} : vector<4x512xf32> to vector<4x496xf32>
    %12 = vector.extract_strided_slice %9 {offsets = [0, 0], sizes = [4, 16], strides = [1, 1]} : vector<4x512xf32> to vector<4x16xf32>
    %13 = tpu.concatenate %11, %12 in 1 : vector<4x496xf32>, vector<4x16xf32> -> vector<4x512xf32>
    %14 = vector.extract_strided_slice %10 {offsets = [0, 16], sizes = [4, 496], strides = [1, 1]} : vector<4x512xf32> to vector<4x496xf32>
    %15 = vector.extract_strided_slice %10 {offsets = [0, 0], sizes = [4, 16], strides = [1, 1]} : vector<4x512xf32> to vector<4x16xf32>
    %16 = tpu.concatenate %14, %15 in 1 : vector<4x496xf32>, vector<4x16xf32> -> vector<4x512xf32>
    %17 = arith.cmpf ogt, %13, %9 : vector<4x512xf32>
    %18 = arith.select %17, %13, %9 : vector<4x512xi1>, vector<4x512xf32>
    %19 = arith.select %17, %16, %10 : vector<4x512xi1>, vector<4x512xf32>
    %c0_3 = arith.constant 0 : index
    %c0_4 = arith.constant 0 : index
    %20 = vector.load %arg1[%c0_3, %c0_4] : memref<7x512xi32, #tpu.memory_space<vmem>>, vector<7x512xi32>
    %21 = vector.extract_strided_slice %20 {offsets = [0, 0], sizes = [1, 512], strides = [1, 1]} : vector<7x512xi32> to vector<1x512xi32>
    %c0_i32 = arith.constant 0 : i32
    %22 = vector.broadcast %c0_i32 : i32 to vector<1x512xi32>
    %23 = arith.cmpi ne, %21, %22 : vector<1x512xi32>
    %24 = vector.extract_strided_slice %18 {offsets = [0, 1], sizes = [4, 511], strides = [1, 1]} : vector<4x512xf32> to vector<4x511xf32>
    %25 = vector.extract_strided_slice %18 {offsets = [0, 0], sizes = [4, 1], strides = [1, 1]} : vector<4x512xf32> to vector<4x1xf32>
    %26 = tpu.concatenate %24, %25 in 1 : vector<4x511xf32>, vector<4x1xf32> -> vector<4x512xf32>
    %27 = vector.shape_cast %23 : vector<1x512xi1> to vector<1x512xi1>
    %28 = vector.broadcast %27 : vector<1x512xi1> to vector<4x512xi1>
    %29 = arith.select %28, %26, %18 : vector<4x512xi1>, vector<4x512xf32>
    %30 = vector.extract_strided_slice %19 {offsets = [0, 1], sizes = [4, 511], strides = [1, 1]} : vector<4x512xf32> to vector<4x511xf32>
    %31 = vector.extract_strided_slice %19 {offsets = [0, 0], sizes = [4, 1], strides = [1, 1]} : vector<4x512xf32> to vector<4x1xf32>
    %32 = tpu.concatenate %30, %31 in 1 : vector<4x511xf32>, vector<4x1xf32> -> vector<4x512xf32>
    %33 = vector.shape_cast %23 : vector<1x512xi1> to vector<1x512xi1>
    %34 = vector.broadcast %33 : vector<1x512xi1> to vector<4x512xi1>
    %35 = arith.select %34, %32, %19 : vector<4x512xi1>, vector<4x512xf32>
    %36 = vector.extract_strided_slice %20 {offsets = [1, 0], sizes = [1, 512], strides = [1, 1]} : vector<7x512xi32> to vector<1x512xi32>
    %c0_i32_5 = arith.constant 0 : i32
    %37 = vector.broadcast %c0_i32_5 : i32 to vector<1x512xi32>
    %38 = arith.cmpi ne, %36, %37 : vector<1x512xi32>
    %39 = vector.extract_strided_slice %29 {offsets = [0, 2], sizes = [4, 510], strides = [1, 1]} : vector<4x512xf32> to vector<4x510xf32>
    %40 = vector.extract_strided_slice %29 {offsets = [0, 0], sizes = [4, 2], strides = [1, 1]} : vector<4x512xf32> to vector<4x2xf32>
    %41 = tpu.concatenate %39, %40 in 1 : vector<4x510xf32>, vector<4x2xf32> -> vector<4x512xf32>
    %42 = vector.shape_cast %38 : vector<1x512xi1> to vector<1x512xi1>
    %43 = vector.broadcast %42 : vector<1x512xi1> to vector<4x512xi1>
    %44 = arith.select %43, %41, %29 : vector<4x512xi1>, vector<4x512xf32>
    %45 = vector.extract_strided_slice %35 {offsets = [0, 2], sizes = [4, 510], strides = [1, 1]} : vector<4x512xf32> to vector<4x510xf32>
    %46 = vector.extract_strided_slice %35 {offsets = [0, 0], sizes = [4, 2], strides = [1, 1]} : vector<4x512xf32> to vector<4x2xf32>
    %47 = tpu.concatenate %45, %46 in 1 : vector<4x510xf32>, vector<4x2xf32> -> vector<4x512xf32>
    %48 = vector.shape_cast %38 : vector<1x512xi1> to vector<1x512xi1>
    %49 = vector.broadcast %48 : vector<1x512xi1> to vector<4x512xi1>
    %50 = arith.select %49, %47, %35 : vector<4x512xi1>, vector<4x512xf32>
    %51 = vector.extract_strided_slice %20 {offsets = [2, 0], sizes = [1, 512], strides = [1, 1]} : vector<7x512xi32> to vector<1x512xi32>
    %c0_i32_6 = arith.constant 0 : i32
    %52 = vector.broadcast %c0_i32_6 : i32 to vector<1x512xi32>
    %53 = arith.cmpi ne, %51, %52 : vector<1x512xi32>
    %54 = vector.extract_strided_slice %44 {offsets = [0, 4], sizes = [4, 508], strides = [1, 1]} : vector<4x512xf32> to vector<4x508xf32>
    %55 = vector.extract_strided_slice %44 {offsets = [0, 0], sizes = [4, 4], strides = [1, 1]} : vector<4x512xf32> to vector<4x4xf32>
    %56 = tpu.concatenate %54, %55 in 1 : vector<4x508xf32>, vector<4x4xf32> -> vector<4x512xf32>
    %57 = vector.shape_cast %53 : vector<1x512xi1> to vector<1x512xi1>
    %58 = vector.broadcast %57 : vector<1x512xi1> to vector<4x512xi1>
    %59 = arith.select %58, %56, %44 : vector<4x512xi1>, vector<4x512xf32>
    %60 = vector.extract_strided_slice %50 {offsets = [0, 4], sizes = [4, 508], strides = [1, 1]} : vector<4x512xf32> to vector<4x508xf32>
    %61 = vector.extract_strided_slice %50 {offsets = [0, 0], sizes = [4, 4], strides = [1, 1]} : vector<4x512xf32> to vector<4x4xf32>
    %62 = tpu.concatenate %60, %61 in 1 : vector<4x508xf32>, vector<4x4xf32> -> vector<4x512xf32>
    %63 = vector.shape_cast %53 : vector<1x512xi1> to vector<1x512xi1>
    %64 = vector.broadcast %63 : vector<1x512xi1> to vector<4x512xi1>
    %65 = arith.select %64, %62, %50 : vector<4x512xi1>, vector<4x512xf32>
    %66 = vector.extract_strided_slice %20 {offsets = [3, 0], sizes = [1, 512], strides = [1, 1]} : vector<7x512xi32> to vector<1x512xi32>
    %c0_i32_7 = arith.constant 0 : i32
    %67 = vector.broadcast %c0_i32_7 : i32 to vector<1x512xi32>
    %68 = arith.cmpi ne, %66, %67 : vector<1x512xi32>
    %69 = vector.extract_strided_slice %59 {offsets = [0, 24], sizes = [4, 488], strides = [1, 1]} : vector<4x512xf32> to vector<4x488xf32>
    %70 = vector.extract_strided_slice %59 {offsets = [0, 0], sizes = [4, 24], strides = [1, 1]} : vector<4x512xf32> to vector<4x24xf32>
    %71 = tpu.concatenate %69, %70 in 1 : vector<4x488xf32>, vector<4x24xf32> -> vector<4x512xf32>
    %72 = vector.shape_cast %68 : vector<1x512xi1> to vector<1x512xi1>
    %73 = vector.broadcast %72 : vector<1x512xi1> to vector<4x512xi1>
    %74 = arith.select %73, %71, %59 : vector<4x512xi1>, vector<4x512xf32>
    %75 = vector.extract_strided_slice %65 {offsets = [0, 24], sizes = [4, 488], strides = [1, 1]} : vector<4x512xf32> to vector<4x488xf32>
    %76 = vector.extract_strided_slice %65 {offsets = [0, 0], sizes = [4, 24], strides = [1, 1]} : vector<4x512xf32> to vector<4x24xf32>
    %77 = tpu.concatenate %75, %76 in 1 : vector<4x488xf32>, vector<4x24xf32> -> vector<4x512xf32>
    %78 = vector.shape_cast %68 : vector<1x512xi1> to vector<1x512xi1>
    %79 = vector.broadcast %78 : vector<1x512xi1> to vector<4x512xi1>
    %80 = arith.select %79, %77, %65 : vector<4x512xi1>, vector<4x512xf32>
    %81 = vector.extract_strided_slice %20 {offsets = [4, 0], sizes = [1, 512], strides = [1, 1]} : vector<7x512xi32> to vector<1x512xi32>
    %c0_i32_8 = arith.constant 0 : i32
    %82 = vector.broadcast %c0_i32_8 : i32 to vector<1x512xi32>
    %83 = arith.cmpi ne, %81, %82 : vector<1x512xi32>
    %84 = vector.extract_strided_slice %74 {offsets = [0, 48], sizes = [4, 464], strides = [1, 1]} : vector<4x512xf32> to vector<4x464xf32>
    %85 = vector.extract_strided_slice %74 {offsets = [0, 0], sizes = [4, 48], strides = [1, 1]} : vector<4x512xf32> to vector<4x48xf32>
    %86 = tpu.concatenate %84, %85 in 1 : vector<4x464xf32>, vector<4x48xf32> -> vector<4x512xf32>
    %87 = vector.shape_cast %83 : vector<1x512xi1> to vector<1x512xi1>
    %88 = vector.broadcast %87 : vector<1x512xi1> to vector<4x512xi1>
    %89 = arith.select %88, %86, %74 : vector<4x512xi1>, vector<4x512xf32>
    %90 = vector.extract_strided_slice %80 {offsets = [0, 48], sizes = [4, 464], strides = [1, 1]} : vector<4x512xf32> to vector<4x464xf32>
    %91 = vector.extract_strided_slice %80 {offsets = [0, 0], sizes = [4, 48], strides = [1, 1]} : vector<4x512xf32> to vector<4x48xf32>
    %92 = tpu.concatenate %90, %91 in 1 : vector<4x464xf32>, vector<4x48xf32> -> vector<4x512xf32>
    %93 = vector.shape_cast %83 : vector<1x512xi1> to vector<1x512xi1>
    %94 = vector.broadcast %93 : vector<1x512xi1> to vector<4x512xi1>
    %95 = arith.select %94, %92, %80 : vector<4x512xi1>, vector<4x512xf32>
    %96 = vector.extract_strided_slice %20 {offsets = [5, 0], sizes = [1, 512], strides = [1, 1]} : vector<7x512xi32> to vector<1x512xi32>
    %c0_i32_9 = arith.constant 0 : i32
    %97 = vector.broadcast %c0_i32_9 : i32 to vector<1x512xi32>
    %98 = arith.cmpi ne, %96, %97 : vector<1x512xi32>
    %99 = vector.extract_strided_slice %89 {offsets = [0, 96], sizes = [4, 416], strides = [1, 1]} : vector<4x512xf32> to vector<4x416xf32>
    %100 = vector.extract_strided_slice %89 {offsets = [0, 0], sizes = [4, 96], strides = [1, 1]} : vector<4x512xf32> to vector<4x96xf32>
    %101 = tpu.concatenate %99, %100 in 1 : vector<4x416xf32>, vector<4x96xf32> -> vector<4x512xf32>
    %102 = vector.shape_cast %98 : vector<1x512xi1> to vector<1x512xi1>
    %103 = vector.broadcast %102 : vector<1x512xi1> to vector<4x512xi1>
    %104 = arith.select %103, %101, %89 : vector<4x512xi1>, vector<4x512xf32>
    %105 = vector.extract_strided_slice %95 {offsets = [0, 96], sizes = [4, 416], strides = [1, 1]} : vector<4x512xf32> to vector<4x416xf32>
    %106 = vector.extract_strided_slice %95 {offsets = [0, 0], sizes = [4, 96], strides = [1, 1]} : vector<4x512xf32> to vector<4x96xf32>
    %107 = tpu.concatenate %105, %106 in 1 : vector<4x416xf32>, vector<4x96xf32> -> vector<4x512xf32>
    %108 = vector.shape_cast %98 : vector<1x512xi1> to vector<1x512xi1>
    %109 = vector.broadcast %108 : vector<1x512xi1> to vector<4x512xi1>
    %110 = arith.select %109, %107, %95 : vector<4x512xi1>, vector<4x512xf32>
    %111 = vector.extract_strided_slice %20 {offsets = [6, 0], sizes = [1, 512], strides = [1, 1]} : vector<7x512xi32> to vector<1x512xi32>
    %c0_i32_10 = arith.constant 0 : i32
    %112 = vector.broadcast %c0_i32_10 : i32 to vector<1x512xi32>
    %113 = arith.cmpi ne, %111, %112 : vector<1x512xi32>
    %114 = vector.extract_strided_slice %104 {offsets = [0, 192], sizes = [4, 320], strides = [1, 1]} : vector<4x512xf32> to vector<4x320xf32>
    %115 = vector.extract_strided_slice %104 {offsets = [0, 0], sizes = [4, 192], strides = [1, 1]} : vector<4x512xf32> to vector<4x192xf32>
    %116 = tpu.concatenate %114, %115 in 1 : vector<4x320xf32>, vector<4x192xf32> -> vector<4x512xf32>
    %117 = vector.shape_cast %113 : vector<1x512xi1> to vector<1x512xi1>
    %118 = vector.broadcast %117 : vector<1x512xi1> to vector<4x512xi1>
    %119 = arith.select %118, %116, %104 : vector<4x512xi1>, vector<4x512xf32>
    %120 = vector.extract_strided_slice %110 {offsets = [0, 192], sizes = [4, 320], strides = [1, 1]} : vector<4x512xf32> to vector<4x320xf32>
    %121 = vector.extract_strided_slice %110 {offsets = [0, 0], sizes = [4, 192], strides = [1, 1]} : vector<4x512xf32> to vector<4x192xf32>
    %122 = tpu.concatenate %120, %121 in 1 : vector<4x320xf32>, vector<4x192xf32> -> vector<4x512xf32>
    %123 = vector.shape_cast %113 : vector<1x512xi1> to vector<1x512xi1>
    %124 = vector.broadcast %123 : vector<1x512xi1> to vector<4x512xi1>
    %125 = arith.select %124, %122, %110 : vector<4x512xi1>, vector<4x512xf32>
    %126 = vector.extract_strided_slice %119 {offsets = [0, 0], sizes = [4, 128], strides = [1, 1]} : vector<4x512xf32> to vector<4x128xf32>
    %c0_11 = arith.constant 0 : index
    %c0_12 = arith.constant 0 : index
    %127 = vector.load %arg4[%c0_11, %c0_12] : memref<4x128xf32, #tpu.memory_space<vmem>>, vector<4x128xf32>
    tpu.vector_store %arg4[%c0_11, %c0_12], %126 {strides = array<i32>} : memref<4x128xf32, #tpu.memory_space<vmem>>, vector<4x128xf32>,
    %128 = vector.extract_strided_slice %125 {offsets = [0, 0], sizes = [4, 128], strides = [1, 1]} : vector<4x512xf32> to vector<4x128xf32>
    %c0_13 = arith.constant 0 : index
    %c0_14 = arith.constant 0 : index
    %129 = vector.load %arg5[%c0_13, %c0_14] : memref<4x128xf32, #tpu.memory_space<vmem>>, vector<4x128xf32>
    tpu.vector_store %arg5[%c0_13, %c0_14], %128 {strides = array<i32>} : memref<4x128xf32, #tpu.memory_space<vmem>>, vector<4x128xf32>,
    return
  }
  func.func @transform_0(%arg0: i32) -> (i32, i32) {
    %c0_i32 = arith.constant 0 : i32
    %c0_i32_0 = arith.constant 0 : i32
    %c0_i32_1 = arith.constant 0 : i32
    return %c0_i32, %c0_i32_0 : i32, i32
  }
  func.func @transform_1(%arg0: i32) -> (i32, i32) {
    %c0_i32 = arith.constant 0 : i32
    %c0_i32_0 = arith.constant 0 : i32
    return %arg0, %c0_i32 : i32, i32
  }
  func.func @transform_2(%arg0: i32) -> (i32, i32) {
    %c0_i32 = arith.constant 0 : i32
    %c0_i32_0 = arith.constant 0 : i32
    return %arg0, %c0_i32 : i32, i32
  }
  func.func @transform_3(%arg0: i32) -> (i32, i32) {
    %c0_i32 = arith.constant 0 : i32
    %c0_i32_0 = arith.constant 0 : i32
    return %arg0, %c0_i32 : i32, i32
  }
  func.func @transform_4(%arg0: i32) -> (i32, i32) {
    %c0_i32 = arith.constant 0 : i32
    %c0_i32_0 = arith.constant 0 : i32
    return %arg0, %c0_i32 : i32, i32
  }
}

</mosaic_0001>

<bundles_post_ra>
// kernel: tpu_custom_call.1
= control target key start
LH: loop header
LB: loop body
LE: loop exit
PB: predicated region body
PF: predicated region fallthrough
CT: control target
= control target key end

     0   :  { %6 = vsyncpa [#allocation3], 0  ;;  %s128_s0 = inlined_call_operand.hbm [shape: f32[8,128], index: 0, kind: input, shape index: {}]   ;;  %s129_s1 = inlined_call_operand.hbm [shape: f32[8,128], index: 1, kind: output, shape index: {}]  }
   0x1   :  { %7 = vsyncpa [#allocation4], 0  ;;  %s91_s6 = smov [#allocation2]   ;;  %s43_s10 = scalar_lea.hbm %s128_s0, 128 }
   0x2   :  { %s14_s7 = sshll.u32 %s91_s6, 4  ;;  %p44_p0 = scmp.ne.s32.totalorder %s128_s0, %s43_s10  ;;  %s15_s7 = int_to_ptr.vmem [resolvable:$true] %s14_s7 }
   0x3   :  { %p47_p1 = scmp.lt.u32.totalorder %s43_s10, %s128_s0 }
   0x5   :  { %p49_p2 = pnand %p47_p1, %p44_p0 }
   0x7   :  { %52 = shalt.err (!%p49_p2)
}
   0x8   :  { %s53_s15 = scalar_lea.vmem %s15_s7, 128  ;;  %p58_p4 = scmp.lt.s32.totalorder %s15_s7, %s15_s7 }
   0x9   :  { %p54_p3 = scmp.ne.s32.totalorder %s15_s7, %s53_s15  ;;  %p59_p5 = scmp.lt.s32.totalorder %s53_s15, %s53_s15 }
   0xb   :  { %p60_p6 = por %p59_p5, %p58_p4 }
   0xd   :  { %p61_p7 = pnand %p60_p6, %p54_p3 }
   0xf   :  { %64 = shalt.err (!%p61_p7)
}
  0x10   :  { %17 = dma.hbm_to_vmem [thread:$0]  %s128_s0, 128, %s15_s7, [#allocation3]  }
  0x11   :  { %87 = dma.done.wait [#allocation3], 128  }
  0x12   :  { %88 = vsyncadd [#allocation3], 4294967168  ;;  %v21_v0 = vld [vmem:[#allocation2] sm:$0xff]  ;;  %s92_s18 = smov 1   ;;  %s93_s19 = smov [#allocation5]  }
  0x13   :  { %22 = vrot.lane.b32.xlu0 %v21_v0, %s92_s18  ;;  %s31_s20 = sshll.u32 %s93_s19, 4  ;;  %s32_s20 = int_to_ptr.vmem [resolvable:$true] %s31_s20 }
  0x14   :  { %s65_s21 = scalar_lea.vmem %s32_s20, 128  ;;  %p70_p9 = scmp.lt.s32.totalorder %s32_s20, %s32_s20 }
  0x15   :  { %p66_p8 = scmp.ne.s32.totalorder %s32_s20, %s65_s21  ;;  %p71_p10 = scmp.lt.s32.totalorder %s65_s21, %s65_s21 }
  0x17   :  { %p72_p11 = por %p71_p10, %p70_p9 }
  0x19   :  { %p73_p12 = pnand %p72_p11, %p66_p8 }
  0x85   :  { %v23_v1 = vpop.permute.xlu0 %22 }
  0x86   :  { %24 = vst [vmem:[#allocation5] sm:$0xff] %v23_v1 }
  0x87   :  { %76 = shalt.err (!%p73_p12)
}
  0x88   :  { %s77_s0 = scalar_lea.hbm %s129_s1, 128 }
  0x89   :  { %p78_p13 = scmp.ne.s32.totalorder %s129_s1, %s77_s0  ;;  %p81_p0 = scmp.lt.u32.totalorder %s77_s0, %s129_s1 }
  0x8b   :  { %p83_p1 = pnand %p81_p0, %p78_p13 }
  0x8d   :  { %86 = shalt.err (!%p83_p1)
}
  0x8e   :  { %34 = dma.vmem_to_hbm [thread:$0]  %s32_s20, 128, %s129_s1, [#allocation4]  }
  0x8f   :  { %89 = dma.done.wait [#allocation4], 128  }
  0x90   :  { %90 = vsyncadd [#allocation4], 4294967168 }
  0x91   :  { %38 = vsyncpa [#allocation3], 1 }
  0x92   :  { %39 = vsyncpa [#allocation4], 1 }

// kernel: tpu_custom_call.1
= control target key start
LH: loop header
LB: loop body
LE: loop exit
PB: predicated region body
PF: predicated region fallthrough
CT: control target
= control target key end

     0   :  { %10 = vsyncpa [#allocation3], 0  ;;  %s1233_s0 = inlined_call_operand.hbm [shape: s32[7,512], index: 0, kind: input, shape index: {}]   ;;  %s1234_s1 = inlined_call_operand.hbm [shape: f32[4,512], index: 1, kind: input, shape index: {}]   ;;  %s1235_s2 = inlined_call_operand.hbm [shape: f32[4,512], index: 2, kind: input, shape index: {}]   ;;  %s1236_s3 = inlined_call_operand.hbm [shape: f32[4,128], index: 3, kind: output, shape index: {0}]   ;;  %s1237_s4 = inlined_call_operand.hbm [shape: f32[4,128], index: 4, kind: output, shape index: {1}]  }
   0x1   :  { %11 = vsyncpa [#allocation6], 0 }
   0x2   :  { %12 = vsyncpa [#allocation4], 0 }
   0x3   :  { %13 = vsyncpa [#allocation10], 0  ;;  %s787_s15 = smov [#allocation5]   ;;  %s788_s17 = smov [#allocation2]  }
   0x4   :  { %s30_s16 = sshll.u32 %s787_s15, 4  ;;  %s20_s18 = sshll.u32 %s788_s17, 4  ;;  %s31_s16 = int_to_ptr.vmem [resolvable:$true] %s30_s16  ;;  %s21_s18 = int_to_ptr.vmem [resolvable:$true] %s20_s18 }
   0x5   :  { %s669_s21 = scalar_lea.hbm %s1234_s1, 256 }
   0x6   :  { %p670_p0 = scmp.ne.s32.totalorder %s1234_s1, %s669_s21  ;;  %p673_p1 = scmp.lt.u32.totalorder %s669_s21, %s1234_s1 }
   0x8   :  { %p675_p2 = pnand %p673_p1, %p670_p0 }
   0xa   :  { %678 = shalt.err (!%p675_p2)
}
   0xb   :  { %s679_s26 = scalar_lea.vmem %s31_s16, 256  ;;  %p684_p4 = scmp.lt.s32.totalorder %s31_s16, %s31_s16 }
   0xc   :  { %p680_p3 = scmp.ne.s32.totalorder %s31_s16, %s679_s26  ;;  %p685_p5 = scmp.lt.s32.totalorder %s679_s26, %s679_s26 }
   0xe   :  { %p686_p6 = por %p685_p5, %p684_p4 }
  0x10   :  { %p687_p7 = pnand %p686_p6, %p680_p3 }
  0x12   :  { %690 = shalt.err (!%p687_p7)
}
  0x13   :  { %33 = dma.hbm_to_vmem [thread:$0]  %s1234_s1, 256, %s31_s16, [#allocation6]  }
  0x14   :  { %s691_s5 = scalar_lea.hbm %s1233_s0, 512 }
  0x15   :  { %p692_p8 = scmp.ne.s32.totalorder %s1233_s0, %s691_s5  ;;  %p695_p9 = scmp.lt.u32.totalorder %s691_s5, %s1233_s0 }
  0x17   :  { %p697_p10 = pnand %p695_p9, %p692_p8 }
  0x19   :  { %700 = shalt.err (!%p697_p10)
}
  0x1a   :  { %s701_s10 = scalar_lea.vmem %s21_s18, 512  ;;  %p706_p12 = scmp.lt.s32.totalorder %s21_s18, %s21_s18 }
  0x1b   :  { %p702_p11 = scmp.ne.s32.totalorder %s21_s18, %s701_s10  ;;  %p707_p13 = scmp.lt.s32.totalorder %s701_s10, %s701_s10 }
  0x1d   :  { %p708_p0 = por %p707_p13, %p706_p12 }
  0x1f   :  { %p709_p1 = pnand %p708_p0, %p702_p11 }
  0x21   :  { %712 = shalt.err (!%p709_p1)
}
  0x22   :  { %23 = dma.hbm_to_vmem [thread:$0]  %s1233_s0, 512, %s21_s18, [#allocation3]  }
  0x23   :  { %s789_s12 = smov [#allocation7]   ;;  %s713_s16 = scalar_lea.hbm %s1235_s2, 256 }
  0x24   :  { %s40_s13 = sshll.u32 %s789_s12, 4  ;;  %p714_p2 = scmp.ne.s32.totalorder %s1235_s2, %s713_s16  ;;  %s41_s13 = int_to_ptr.vmem [resolvable:$true] %s40_s13 }
  0x25   :  { %p717_p3 = scmp.lt.u32.totalorder %s713_s16, %s1235_s2 }
  0x27   :  { %p719_p4 = pnand %p717_p3, %p714_p2 }
  0x29   :  { %722 = shalt.err (!%p719_p4)
}
  0x2a   :  { %s723_s22 = scalar_lea.vmem %s41_s13, 256  ;;  %p728_p6 = scmp.lt.s32.totalorder %s41_s13, %s41_s13 }
  0x2b   :  { %p724_p5 = scmp.ne.s32.totalorder %s41_s13, %s723_s22  ;;  %p729_p7 = scmp.lt.s32.totalorder %s723_s22, %s723_s22 }
  0x2d   :  { %p730_p8 = por %p729_p7, %p728_p6 }
  0x2f   :  { %p731_p9 = pnand %p730_p8, %p724_p5 }
  0x31   :  { %734 = shalt.err (!%p731_p9)
}
  0x32   :  { %43 = dma.hbm_to_vmem [thread:$0]  %s1235_s2, 256, %s41_s13, [#allocation6]  }
  0x33   :  { %779 = dma.done.wait [#allocation3], 512  }
  0x34   :  { %780 = vsyncadd [#allocation3], 4294966784 }
  0x35   :  { %781 = dma.done.wait [#allocation6], 512  }
  0x36   :  { %782 = vsyncadd [#allocation6], 4294966784  ;;  %v54_v0 = vld [vmem:[#allocation5 + $0x8] sm:$0xff]  ;;  %v53_v1 = vld [vmem:[#allocation5] sm:$0xff]  ;;  %s790_s23 = smov 127   ;;  %vm69_vm0 = vcmask 1039360   ;;  %v204_v56 = vlaneseq }
  0x37   :  { %65 = vrot.lane.b32.xlu1 %v54_v0, %s790_s23  ;;  %61 = vrot.lane.b32.xlu0 %v53_v1, %s790_s23  ;;  %v60_v2 = vcombine.high %v54_v0, %v54_v0  ;;  %v55_v3 = vld [vmem:[#allocation7] sm:$0xff]  ;;  %v59_v5 = vcombine.high %v53_v1, %v53_v1  ;;  %v56_v6 = vld [vmem:[#allocation7 + $0x8] sm:$0xff]  ;;  %s791_s2 = smov 112   ;;  %vm128_vm5 = vcmask 916480   ;;  %v171_v57 = vld [vmem:[#allocation2] sm:$0x7f] }
  0x38   :  { %v81_v4 = vcombine.high %v55_v3, %v55_v3  ;;  %v82_v7 = vcombine.high %v56_v6, %v56_v6  ;;  %v172_v58 = vld [vmem:[#allocation2 + $0x8] sm:$0x7f]  ;;  %v910_v59 = vshrl.u32 %v204_v56, 7  ;;  %vm175_vm10 = vcmp.ne.s32.totalorder %v171_v57, 0  ;;  %v173_v60 = vld [vmem:[#allocation2 + $0x10] sm:$0x7f] }
  0x39   :  { %vm176_vm11 = vcmp.ne.s32.totalorder %v172_v58, 0  ;;  %v174_v61 = vld [vmem:[#allocation2 + $0x18] sm:$0x7f]  ;;  %v792_v63 = vmov 0   ;;  %vm177_vm12 = vcmp.ne.s32.totalorder %v173_v60, 0  ;;  %s793_s24 = smov 126  }
  0x3a   :  { %v206_v62 = vsub.s32 0, %v910_v59  ;;  %vm178_vm13 = vcmp.ne.s32.totalorder %v174_v61, 0  ;;  %s794_s25 = smov 124   ;;  %s795_s26 = smov 104  }
  0x3b   :  { %67 = vrot.lane.b32.xlu1 %v60_v2, %s790_s23  ;;  %83 = vrot.lane.b32.xlu0 %v55_v3, %s790_s23  ;;  %s796_s27 = smov 80   ;;  %s797_s28 = smov 32  }
  0x3c   :  { %s798_s29 = smov 64   ;;  %s799_s30 = smov [#allocation8]  }
  0x3d   :  { %s627_s5 = sshll.u32 %s799_s30, 4  ;;  %s628_s5 = int_to_ptr.vmem [resolvable:$true] %s627_s5 }
  0x3e   :  { %s735_s6 = scalar_lea.vmem %s628_s5, 64  ;;  %p740_p11 = scmp.lt.s32.totalorder %s628_s5, %s628_s5 }
  0x3f   :  { %85 = vrot.lane.b32.xlu1 %v81_v4, %s790_s23  ;;  %63 = vrot.lane.b32.xlu0 %v59_v5, %s790_s23  ;;  %p736_p10 = scmp.ne.s32.totalorder %s628_s5, %s735_s6  ;;  %p741_p12 = scmp.lt.s32.totalorder %s735_s6, %s735_s6 }
  0x41   :  { %p742_p13 = por %p741_p12, %p740_p11 }
  0x43   :  { %89 = vrot.lane.b32.xlu1 %v82_v7, %s790_s23  ;;  %87 = vrot.lane.b32.xlu0 %v56_v6, %s790_s23  ;;  %p743_p0 = pnand %p742_p13, %p736_p10 }
  0xa9   :  { %v66_v8 = vpop.permute.xlu1 %65  ;;  %v62_v9 = vpop.permute.xlu0 %61 }
  0xad   :  { %v84_v10 = vpop.permute.xlu0 %83  ;;  %v68_v11 = vpop.permute.xlu1 %67 }
  0xae   :  { %v72_v13 = vsel %vm69_vm0, %v66_v8, %v68_v11  ;;  %v78_v14 = vsel %vm69_vm0, %v68_v11, %v62_v9 }
  0xaf   :  { %vm104_vm3 = vcmp.gt.f32.partialorder %v72_v13, %v54_v0  ;;  %vm105_vm4 = vcmp.gt.f32.partialorder %v78_v14, %v60_v2 }
  0xb0   :  { %v109_v21 = vsel %vm105_vm4, %v78_v14, %v60_v2  ;;  %v108_v22 = vsel %vm104_vm3, %v72_v13, %v54_v0  ;;  %v913_v0 = vsel %vm175_vm10, 1, %v792_v63 }
  0xb1   :  { %v64_v12 = vpop.permute.xlu0 %63  ;;  %v86_v17 = vpop.permute.xlu1 %85  ;;  %v207_v2 = vrot.slane %v913_v0, %v206_v62 }
  0xb2   :  { %v70_v15 = vsel %vm69_vm0, %v62_v9, %v64_v12  ;;  %v71_v16 = vsel %vm69_vm0, %v64_v12, %v66_v8  ;;  %v91_v23 = vsel %vm69_vm0, %v84_v10, %v86_v17 }
  0xb3   :  { %vm102_vm1 = vcmp.gt.f32.partialorder %v70_v15, %v53_v1  ;;  %vm103_vm2 = vcmp.gt.f32.partialorder %v71_v16, %v59_v5  ;;  %vm923_vm14 = vcmp.eq.s32.totalorder %v207_v2, 1 }
  0xb4   :  { %v107_v18 = vsel %vm103_vm2, %v71_v16, %v59_v5  ;;  %v106_v19 = vsel %vm102_vm1, %v70_v15, %v53_v1  ;;  %v112_v26 = vsel %vm102_vm1, %v91_v23, %v55_v3  ;;  %v915_v1 = vsel %vm176_vm11, 1, %v792_v63 }
  0xb5   :  { %122 = vrot.lane.b32.xlu1 %v107_v18, %s791_s2  ;;  %120 = vrot.lane.b32.xlu0 %v106_v19, %s791_s2  ;;  %v88_v20 = vpop.permute.xlu0 %87  ;;  %v90_v25 = vpop.permute.xlu1 %89  ;;  %v211_v3 = vrot.slane %v915_v1, %v206_v62  ;;  %v919_v5 = vsel %vm177_vm12, 1, %v792_v63  ;;  %vm407_vm12 = vcmask 850944  }
  0xb6   :  { %v92_v24 = vsel %vm69_vm0, %v86_v17, %v88_v20  ;;  %v99_v28 = vsel %vm69_vm0, %v90_v25, %v84_v10  ;;  %v93_v29 = vsel %vm69_vm0, %v88_v20, %v90_v25  ;;  %v215_v9 = vrot.slane %v919_v5, %v206_v62 }
  0xb7   :  { %v113_v27 = vsel %vm103_vm2, %v92_v24, %v81_v4  ;;  %v114_v30 = vsel %vm104_vm3, %v93_v29, %v56_v6  ;;  %v115_v31 = vsel %vm105_vm4, %v99_v28, %v82_v7  ;;  %v921_v6 = vsel %vm178_vm13, 1, %v792_v63 }
  0xb8   :  { %vm927_vm15 = vcmp.eq.s32.totalorder %v211_v3, 1  ;;  %v219_v10 = vrot.slane %v921_v6, %v206_v62  ;;  %vm939_vm1 = vcmp.eq.s32.totalorder %v215_v9, 1  ;;  %vm265_vm3 = vcmask 1031168  }
  0xb9   :  { %126 = vrot.lane.b32.xlu1 %v109_v21, %s791_s2  ;;  %124 = vrot.lane.b32.xlu0 %v108_v22, %s791_s2 }
  0xba   :  { %vm943_vm2 = vcmp.eq.s32.totalorder %v219_v10, 1  ;;  %v348_v10 = vsub.s32 2, %v910_v59 }
  0xbc   :  { %v361_v17 = vrot.slane %v921_v6, %v348_v10 }
  0xbd   :  { %142 = vrot.lane.b32.xlu0 %v112_v26, %s791_s2  ;;  %144 = vrot.lane.b32.xlu1 %v113_v27, %s791_s2 }
  0xbe   :  { %vm1041_vm11 = vcmp.eq.s32.totalorder %v361_v17, 1  ;;  %v490_v17 = vsub.s32 4, %v910_v59 }
  0xc1   :  { %146 = vrot.lane.b32.xlu0 %v114_v30, %s791_s2  ;;  %148 = vrot.lane.b32.xlu1 %v115_v31, %s791_s2 }
 0x127   :  { %v123_v32 = vpop.permute.xlu1 %122  ;;  %v121_v33 = vpop.permute.xlu0 %120 }
 0x128   :  { %v129_v34 = vsel %vm128_vm5, %v121_v33, %v123_v32 }
 0x129   :  { %vm159_vm6 = vcmp.gt.f32.partialorder %v129_v34, %v106_v19 }
 0x12a   :  { %v163_v35 = vsel %vm159_vm6, %v129_v34, %v106_v19 }
 0x12b   :  { %v127_v36 = vpop.permute.xlu1 %126  ;;  %183 = vrot.lane.b32.xlu0 %v163_v35, %s790_s23  ;;  %v125_v37 = vpop.permute.xlu0 %124 }
 0x12c   :  { %v137_v38 = vsel %vm128_vm5, %v127_v36, %v121_v33  ;;  %v130_v39 = vsel %vm128_vm5, %v123_v32, %v125_v37  ;;  %v131_v40 = vsel %vm128_vm5, %v125_v37, %v127_v36  ;;  %v277_v36 = vsub.s32 1, %v910_v59 }
 0x12d   :  { %vm160_vm7 = vcmp.gt.f32.partialorder %v130_v39, %v107_v18  ;;  %vm161_vm8 = vcmp.gt.f32.partialorder %v131_v40, %v108_v22  ;;  %vm162_vm9 = vcmp.gt.f32.partialorder %v137_v38, %v109_v21 }
 0x12e   :  { %v165_v41 = vsel %vm161_vm8, %v131_v40, %v108_v22  ;;  %v164_v42 = vsel %vm160_vm7, %v130_v39, %v107_v18  ;;  %v166_v47 = vsel %vm162_vm9, %v137_v38, %v109_v21  ;;  %v278_v37 = vrot.slane %v913_v0, %v277_v36 }
 0x12f   :  { %v145_v43 = vpop.permute.xlu1 %144  ;;  %187 = vrot.lane.b32.xlu0 %v165_v41, %s790_s23  ;;  %185 = vrot.lane.b32.xlu1 %v164_v42, %s790_s23  ;;  %v143_v44 = vpop.permute.xlu0 %142  ;;  %v286_v39 = vrot.slane %v919_v5, %v277_v36  ;;  %v282_v40 = vrot.slane %v915_v1, %v277_v36 }
 0x130   :  { %v150_v45 = vsel %vm128_vm5, %v143_v44, %v145_v43  ;;  %vm967_vm4 = vcmp.eq.s32.totalorder %v278_v37, 1 }
 0x131   :  { %v167_v46 = vsel %vm159_vm6, %v150_v45, %v112_v26 }
 0x133   :  { %v149_v48 = vpop.permute.xlu1 %148  ;;  %189 = vrot.lane.b32.xlu1 %v166_v47, %s790_s23  ;;  %232 = vrot.lane.b32.xlu0 %v167_v46, %s790_s23  ;;  %v147_v49 = vpop.permute.xlu0 %146 }
 0x134   :  { %v151_v50 = vsel %vm128_vm5, %v145_v43, %v147_v49  ;;  %v152_v51 = vsel %vm128_vm5, %v147_v49, %v149_v48  ;;  %v158_v54 = vsel %vm128_vm5, %v149_v48, %v143_v44  ;;  %vm981_vm5 = vcmp.eq.s32.totalorder %v282_v40, 1 }
 0x135   :  { %v169_v52 = vsel %vm161_vm8, %v152_v51, %v114_v30  ;;  %v168_v53 = vsel %vm160_vm7, %v151_v50, %v113_v27  ;;  %v170_v55 = vsel %vm162_vm9, %v158_v54, %v115_v31  ;;  %vm336_vm7 = vcmask 1014784  }
 0x137   :  { %236 = vrot.lane.b32.xlu0 %v169_v52, %s790_s23  ;;  %234 = vrot.lane.b32.xlu1 %v168_v53, %s790_s23 }
 0x13b   :  { %238 = vrot.lane.b32.xlu1 %v170_v55, %s790_s23 }
 0x19d   :  { %v184_v4 = vpop.permute.xlu0 %183 }
 0x1a1   :  { %v186_v11 = vpop.permute.xlu1 %185  ;;  %v188_v12 = vpop.permute.xlu0 %187 }
 0x1a2   :  { %v191_v13 = vsel %vm69_vm0, %v184_v4, %v186_v11  ;;  %v192_v14 = vsel %vm69_vm0, %v186_v11, %v188_v12  ;;  %v349_v11 = vrot.slane %v913_v0, %v348_v10 }
 0x1a3   :  { %v224_v15 = vsel %vm923_vm14, %v191_v13, %v163_v35  ;;  %v225_v16 = vsel %vm927_vm15, %v192_v14, %v164_v42 }
 0x1a4   :  { %257 = vrot.lane.b32.xlu0 %v224_v15, %s793_s24  ;;  %259 = vrot.lane.b32.xlu1 %v225_v16, %s793_s24  ;;  %vm1021_vm8 = vcmp.eq.s32.totalorder %v349_v11, 1 }
 0x1a5   :  { %v190_v19 = vpop.permute.xlu1 %189  ;;  %v233_v20 = vpop.permute.xlu0 %232 }
 0x1a6   :  { %v193_v21 = vsel %vm69_vm0, %v188_v12, %v190_v19  ;;  %v199_v22 = vsel %vm69_vm0, %v190_v19, %v184_v4  ;;  %v353_v12 = vrot.slane %v915_v1, %v348_v10 }
 0x1a7   :  { %v226_v23 = vsel %vm939_vm1, %v193_v21, %v165_v41  ;;  %v227_v24 = vsel %vm943_vm2, %v199_v22, %v166_v47  ;;  %v290_v47 = vrot.slane %v921_v6, %v277_v36 }
 0x1a8   :  { %261 = vrot.lane.b32.xlu0 %v226_v23, %s793_s24  ;;  %263 = vrot.lane.b32.xlu1 %v227_v24, %s793_s24  ;;  %vm1025_vm9 = vcmp.eq.s32.totalorder %v353_v12, 1 }
 0x1a9   :  { %v235_v25 = vpop.permute.xlu1 %234  ;;  %v237_v26 = vpop.permute.xlu0 %236  ;;  %vm995_vm6 = vcmp.eq.s32.totalorder %v290_v47, 1 }
 0x1aa   :  { %v240_v27 = vsel %vm69_vm0, %v233_v20, %v235_v25  ;;  %v241_v28 = vsel %vm69_vm0, %v235_v25, %v237_v26 }
 0x1ab   :  { %v249_v29 = vsel %vm923_vm14, %v240_v27, %v167_v46  ;;  %v250_v30 = vsel %vm927_vm15, %v241_v28, %v168_v53 }
 0x1ac   :  { %303 = vrot.lane.b32.xlu0 %v249_v29, %s793_s24  ;;  %305 = vrot.lane.b32.xlu1 %v250_v30, %s793_s24 }
 0x1ad   :  { %v239_v31 = vpop.permute.xlu1 %238 }
 0x1ae   :  { %v242_v32 = vsel %vm69_vm0, %v237_v26, %v239_v31  ;;  %v248_v33 = vsel %vm69_vm0, %v239_v31, %v233_v20  ;;  %vm977_vm0 = vcmp.eq.s32.totalorder %v286_v39, 1 }
 0x1af   :  { %v251_v34 = vsel %vm939_vm1, %v242_v32, %v169_v52  ;;  %v252_v35 = vsel %vm943_vm2, %v248_v33, %v170_v55  ;;  %vm478_vm2 = vcmask 654336  }
 0x1b0   :  { %307 = vrot.lane.b32.xlu0 %v251_v34, %s793_s24  ;;  %309 = vrot.lane.b32.xlu1 %v252_v35, %s793_s24 }
 0x216   :  { %v260_v41 = vpop.permute.xlu1 %259  ;;  %v258_v42 = vpop.permute.xlu0 %257 }
 0x217   :  { %v266_v43 = vsel %vm265_vm3, %v258_v42, %v260_v41 }
 0x218   :  { %v295_v44 = vsel %vm967_vm4, %v266_v43, %v224_v15  ;;  %v419_v43 = vsub.s32 3, %v910_v59 }
 0x219   :  { %328 = vrot.lane.b32.xlu0 %v295_v44, %s794_s25 }
 0x21a   :  { %v264_v48 = vpop.permute.xlu1 %263  ;;  %v262_v49 = vpop.permute.xlu0 %261  ;;  %v428_v46 = vrot.slane %v919_v5, %v419_v43  ;;  %v424_v47 = vrot.slane %v915_v1, %v419_v43 }
 0x21b   :  { %v267_v50 = vsel %vm265_vm3, %v260_v41, %v262_v49  ;;  %v268_v51 = vsel %vm265_vm3, %v262_v49, %v264_v48  ;;  %v274_v54 = vsel %vm265_vm3, %v264_v48, %v258_v42 }
 0x21c   :  { %v297_v52 = vsel %vm977_vm0, %v268_v51, %v226_v23  ;;  %v296_v53 = vsel %vm981_vm5, %v267_v50, %v225_v16  ;;  %v298_v60 = vsel %vm995_vm6, %v274_v54, %v227_v24  ;;  %v357_v16 = vrot.slane %v919_v5, %v348_v10 }
 0x21d   :  { %332 = vrot.lane.b32.xlu0 %v297_v52, %s794_s25  ;;  %330 = vrot.lane.b32.xlu1 %v296_v53, %s794_s25  ;;  %vm1078_vm14 = vcmp.eq.s32.totalorder %v428_v46, 1  ;;  %vm1082_vm15 = vcmp.eq.s32.totalorder %v424_v47, 1  ;;  %v432_v54 = vrot.slane %v921_v6, %v419_v43 }
 0x21e   :  { %v306_v56 = vpop.permute.xlu1 %305  ;;  %v304_v57 = vpop.permute.xlu0 %303  ;;  %vm1037_vm10 = vcmp.eq.s32.totalorder %v357_v16, 1 }
 0x21f   :  { %v311_v58 = vsel %vm265_vm3, %v304_v57, %v306_v56  ;;  %vm1096_vm1 = vcmp.eq.s32.totalorder %v432_v54, 1 }
 0x220   :  { %v320_v61 = vsel %vm967_vm4, %v311_v58, %v249_v29 }
 0x221   :  { %334 = vrot.lane.b32.xlu1 %v298_v60, %s794_s25  ;;  %374 = vrot.lane.b32.xlu0 %v320_v61, %s794_s25 }
 0x222   :  { %v310_v62 = vpop.permute.xlu1 %309  ;;  %v308_v63 = vpop.permute.xlu0 %307 }
 0x223   :  { %v312_v2 = vsel %vm265_vm3, %v306_v56, %v308_v63  ;;  %v313_v3 = vsel %vm265_vm3, %v308_v63, %v310_v62  ;;  %v319_v8 = vsel %vm265_vm3, %v310_v62, %v304_v57 }
 0x224   :  { %v322_v4 = vsel %vm977_vm0, %v313_v3, %v251_v34  ;;  %v321_v7 = vsel %vm981_vm5, %v312_v2, %v250_v30  ;;  %v323_v9 = vsel %vm995_vm6, %v319_v8, %v252_v35  ;;  %vm549_vm6 = vcmask 261120  }
 0x225   :  { %378 = vrot.lane.b32.xlu0 %v322_v4, %s794_s25  ;;  %376 = vrot.lane.b32.xlu1 %v321_v7, %s794_s25 }
 0x229   :  { %380 = vrot.lane.b32.xlu1 %v323_v9, %s794_s25 }
 0x28b   :  { %v329_v13 = vpop.permute.xlu0 %328 }
 0x28f   :  { %v331_v18 = vpop.permute.xlu1 %330  ;;  %v333_v19 = vpop.permute.xlu0 %332 }
 0x290   :  { %v337_v20 = vsel %vm336_vm7, %v329_v13, %v331_v18  ;;  %v338_v21 = vsel %vm336_vm7, %v331_v18, %v333_v19  ;;  %v495_v18 = vrot.slane %v915_v1, %v490_v17 }
 0x291   :  { %v366_v22 = vsel %vm1021_vm8, %v337_v20, %v295_v44  ;;  %v367_v23 = vsel %vm1025_vm9, %v338_v21, %v296_v53  ;;  %v420_v44 = vrot.slane %v913_v0, %v419_v43  ;;  %v499_v21 = vrot.slane %v919_v5, %v490_v17 }
 0x292   :  { %399 = vrot.lane.b32.xlu0 %v366_v22, %s795_s26  ;;  %401 = vrot.lane.b32.xlu1 %v367_v23, %s795_s26  ;;  %vm1121_vm3 = vcmp.eq.s32.totalorder %v495_v18, 1 }
 0x293   :  { %v335_v26 = vpop.permute.xlu1 %334  ;;  %v375_v27 = vpop.permute.xlu0 %374  ;;  %vm1065_vm13 = vcmp.eq.s32.totalorder %v420_v44, 1  ;;  %vm1131_vm4 = vcmp.eq.s32.totalorder %v499_v21, 1 }
 0x294   :  { %v339_v28 = vsel %vm336_vm7, %v333_v19, %v335_v26  ;;  %v345_v29 = vsel %vm336_vm7, %v335_v26, %v329_v13 }
 0x295   :  { %v368_v30 = vsel %vm1037_vm10, %v339_v28, %v297_v52  ;;  %v369_v31 = vsel %vm1041_vm11, %v345_v29, %v298_v60 }
 0x296   :  { %403 = vrot.lane.b32.xlu0 %v368_v30, %s795_s26  ;;  %405 = vrot.lane.b32.xlu1 %v369_v31, %s795_s26 }
 0x297   :  { %v377_v32 = vpop.permute.xlu1 %376  ;;  %v379_v33 = vpop.permute.xlu0 %378 }
 0x298   :  { %v382_v34 = vsel %vm336_vm7, %v375_v27, %v377_v32  ;;  %v383_v35 = vsel %vm336_vm7, %v377_v32, %v379_v33 }
 0x299   :  { %v391_v36 = vsel %vm1021_vm8, %v382_v34, %v320_v61  ;;  %v392_v37 = vsel %vm1025_vm9, %v383_v35, %v321_v7 }
 0x29a   :  { %445 = vrot.lane.b32.xlu0 %v391_v36, %s795_s26  ;;  %447 = vrot.lane.b32.xlu1 %v392_v37, %s795_s26 }
 0x29b   :  { %v381_v38 = vpop.permute.xlu1 %380 }
 0x29c   :  { %v384_v39 = vsel %vm336_vm7, %v379_v33, %v381_v38  ;;  %v390_v40 = vsel %vm336_vm7, %v381_v38, %v375_v27  ;;  %v491_v38 = vrot.slane %v913_v0, %v490_v17 }
 0x29d   :  { %v393_v41 = vsel %vm1037_vm10, %v384_v39, %v322_v4  ;;  %v394_v42 = vsel %vm1041_vm11, %v390_v40, %v323_v9  ;;  %vm601_vm10 = vcmask 523264  }
 0x29e   :  { %449 = vrot.lane.b32.xlu0 %v393_v41, %s795_s26  ;;  %451 = vrot.lane.b32.xlu1 %v394_v42, %s795_s26  ;;  %vm504_vm5 = vcmp.eq.s32.totalorder %v491_v38, 1 }
 0x304   :  { %v402_v48 = vpop.permute.xlu1 %401  ;;  %v400_v49 = vpop.permute.xlu0 %399 }
 0x305   :  { %v408_v50 = vsel %vm407_vm12, %v400_v49, %v402_v48 }
 0x306   :  { %v1074_v51 = vsel %vm1065_vm13, %v408_v50, %v366_v22  ;;  %v503_v22 = vrot.slane %v921_v6, %v490_v17 }
 0x307   :  { %470 = vrot.lane.b32.xlu0 %v1074_v51, %s796_s27 }
 0x308   :  { %v406_v55 = vpop.permute.xlu1 %405  ;;  %v404_v56 = vpop.permute.xlu0 %403  ;;  %vm1135_vm0 = vcmp.eq.s32.totalorder %v503_v22, 1 }
 0x309   :  { %v409_v57 = vsel %vm407_vm12, %v402_v48, %v404_v56  ;;  %v410_v58 = vsel %vm407_vm12, %v404_v56, %v406_v55  ;;  %v416_v62 = vsel %vm407_vm12, %v406_v55, %v400_v49  ;;  %v558_v48 = vsub.s32 5, %v910_v59 }
 0x30a   :  { %v439_v60 = vsel %vm1078_vm14, %v410_v58, %v368_v30  ;;  %v438_v61 = vsel %vm1082_vm15, %v409_v57, %v367_v23  ;;  %v440_v7 = vsel %vm1096_vm1, %v416_v62, %v369_v31 }
 0x30b   :  { %474 = vrot.lane.b32.xlu0 %v439_v60, %s796_s27  ;;  %472 = vrot.lane.b32.xlu1 %v438_v61, %s796_s27  ;;  %v563_v49 = vrot.slane %v915_v1, %v558_v48  ;;  %v567_v50 = vrot.slane %v919_v5, %v558_v48 }
 0x30c   :  { %v448_v2 = vpop.permute.xlu1 %447  ;;  %v446_v3 = vpop.permute.xlu0 %445 }
 0x30d   :  { %v453_v4 = vsel %vm407_vm12, %v446_v3, %v448_v2  ;;  %vm1171_vm7 = vcmp.eq.s32.totalorder %v563_v49, 1  ;;  %vm1175_vm8 = vcmp.eq.s32.totalorder %v567_v50, 1 }
 0x30e   :  { %v462_v8 = vsel %vm1065_vm13, %v453_v4, %v391_v36 }
 0x30f   :  { %476 = vrot.lane.b32.xlu1 %v440_v7, %s796_s27  ;;  %516 = vrot.lane.b32.xlu0 %v462_v8, %s796_s27 }
 0x310   :  { %v452_v9 = vpop.permute.xlu1 %451  ;;  %v450_v10 = vpop.permute.xlu0 %449 }
 0x311   :  { %v454_v11 = vsel %vm407_vm12, %v448_v2, %v450_v10  ;;  %v455_v12 = vsel %vm407_vm12, %v450_v10, %v452_v9  ;;  %v461_v15 = vsel %vm407_vm12, %v452_v9, %v446_v3 }
 0x312   :  { %v464_v13 = vsel %vm1078_vm14, %v455_v12, %v393_v41  ;;  %v463_v14 = vsel %vm1082_vm15, %v454_v11, %v392_v37  ;;  %v465_v16 = vsel %vm1096_vm1, %v461_v15, %v394_v42 }
 0x313   :  { %520 = vrot.lane.b32.xlu0 %v464_v13, %s796_s27  ;;  %518 = vrot.lane.b32.xlu1 %v463_v14, %s796_s27 }
 0x317   :  { %522 = vrot.lane.b32.xlu1 %v465_v16, %s796_s27 }
 0x379   :  { %v471_v19 = vpop.permute.xlu0 %470 }
 0x37d   :  { %v473_v23 = vpop.permute.xlu1 %472  ;;  %v475_v24 = vpop.permute.xlu0 %474 }
 0x37e   :  { %v480_v25 = vsel %vm478_vm2, %v473_v23, %v475_v24  ;;  %v479_v44 = vsel %vm478_vm2, %v471_v19, %v473_v23 }
 0x37f   :  { %v509_v26 = vsel %vm1121_vm3, %v480_v25, %v438_v61  ;;  %v508_v46 = vsel %vm504_vm5, %v479_v44, %v1074_v51 }
 0x380   :  { %543 = vrot.lane.b32.xlu0 %v509_v26, %s797_s28 }
 0x381   :  { %v477_v29 = vpop.permute.xlu1 %476  ;;  %v517_v6 = vpop.permute.xlu0 %516 }
 0x382   :  { %v481_v30 = vsel %vm478_vm2, %v475_v24, %v477_v29  ;;  %v487_v31 = vsel %vm478_vm2, %v477_v29, %v471_v19 }
 0x383   :  { %v510_v32 = vsel %vm1131_vm4, %v481_v30, %v439_v60  ;;  %v511_v33 = vsel %vm1135_vm0, %v487_v31, %v440_v7  ;;  %v559_v60 = vrot.slane %v913_v0, %v558_v48 }
 0x384   :  { %545 = vrot.lane.b32.xlu1 %v510_v32, %s797_s28  ;;  %547 = vrot.lane.b32.xlu0 %v511_v33, %s797_s28 }
 0x385   :  { %v519_v34 = vpop.permute.xlu1 %518  ;;  %v521_v35 = vpop.permute.xlu0 %520  ;;  %vm1192_vm9 = vcmp.eq.s32.totalorder %v559_v60, 1 }
 0x386   :  { %v525_v36 = vsel %vm478_vm2, %v519_v34, %v521_v35  ;;  %v524_v45 = vsel %vm478_vm2, %v517_v6, %v519_v34 }
 0x387   :  { %v534_v37 = vsel %vm1121_vm3, %v525_v36, %v463_v14  ;;  %v1163_v47 = vsel %vm504_vm5, %v524_v45, %v462_v8  ;;  %v606_v14 = vsub.s32 6, %v910_v59 }
 0x388   :  { %580 = vrot.lane.b32.xlu1 %v534_v37, %s797_s28 }
 0x389   :  { %v523_v39 = vpop.permute.xlu1 %522  ;;  %v607_v15 = vrot.slane %v913_v0, %v606_v14 }
 0x38a   :  { %v526_v40 = vsel %vm478_vm2, %v521_v35, %v523_v39  ;;  %v532_v41 = vsel %vm478_vm2, %v523_v39, %v517_v6 }
 0x38b   :  { %v535_v42 = vsel %vm1131_vm4, %v526_v40, %v464_v13  ;;  %v536_v43 = vsel %vm1135_vm0, %v532_v41, %v465_v16  ;;  %vm608_vm11 = vcmp.eq.s32.totalorder %v607_v15, 1 }
 0x38c   :  { %582 = vrot.lane.b32.xlu0 %v535_v42, %s797_s28  ;;  %584 = vrot.lane.b32.xlu1 %v536_v43, %s797_s28 }
 0x390   :  { %541 = vrot.lane.b32.xlu0 %v508_v46, %s797_s28  ;;  %578 = vrot.lane.b32.xlu1 %v1163_v47, %s797_s28 }
 0x3f2   :  { %v544_v52 = vpop.permute.xlu0 %543 }
 0x3f6   :  { %v546_v54 = vpop.permute.xlu1 %545  ;;  %v548_v55 = vpop.permute.xlu0 %547 }
 0x3f7   :  { %v551_v56 = vsel %vm549_vm6, %v544_v52, %v546_v54  ;;  %v552_v57 = vsel %vm549_vm6, %v546_v54, %v548_v55 }
 0x3f8   :  { %v572_v1 = vsel %vm1171_vm7, %v551_v56, %v509_v26  ;;  %v573_v5 = vsel %vm1175_vm8, %v552_v57, %v510_v32 }
 0x3f9   :  { %597 = vrot.lane.b32.xlu0 %v572_v1, %s798_s29  ;;  %599 = vrot.lane.b32.xlu1 %v573_v5, %s798_s29 }
 0x3fa   :  { %v581_v58 = vpop.permute.xlu1 %580 }
 0x3fe   :  { %v585_v61 = vpop.permute.xlu1 %584  ;;  %v583_v62 = vpop.permute.xlu0 %582 }
 0x3ff   :  { %v587_v63 = vsel %vm549_vm6, %v581_v58, %v583_v62  ;;  %v588_v2 = vsel %vm549_vm6, %v583_v62, %v585_v61 }
 0x400   :  { %v594_v3 = vsel %vm1175_vm8, %v588_v2, %v535_v42  ;;  %v593_v4 = vsel %vm1171_vm7, %v587_v63, %v534_v37 }
 0x401   :  { %614 = vrot.lane.b32.xlu1 %v594_v3, %s798_s29  ;;  %612 = vrot.lane.b32.xlu0 %v593_v4, %s798_s29 }
 0x402   :  { %v579_v8 = vpop.permute.xlu1 %578  ;;  %v542_v9 = vpop.permute.xlu0 %541 }
 0x403   :  { %v586_v10 = vsel %vm549_vm6, %v579_v8, %v581_v58  ;;  %v550_v11 = vsel %vm549_vm6, %v542_v9, %v544_v52 }
 0x404   :  { %v592_v12 = vsel %vm1192_vm9, %v586_v10, %v1163_v47  ;;  %v571_v13 = vsel %vm1192_vm9, %v550_v11, %v508_v46 }
 0x46b   :  { %v600_v16 = vpop.permute.xlu1 %599  ;;  %v598_v17 = vpop.permute.xlu0 %597 }
 0x46c   :  { %v602_v18 = vsel %vm601_vm10, %v598_v17, %v600_v16 }
 0x46d   :  { %v609_v19 = vsel %vm608_vm11, %v602_v18, %v571_v13 }
 0x46e   :  { %619 = vst [vmem:[#allocation8] sm:$0xf] %v609_v19 }
 0x46f   :  { %746 = shalt.err (!%p743_p0)
}
 0x470   :  { %s747_s9 = scalar_lea.hbm %s1236_s3, 64 }
 0x471   :  { %p748_p1 = scmp.ne.s32.totalorder %s1236_s3, %s747_s9  ;;  %p751_p2 = scmp.lt.u32.totalorder %s747_s9, %s1236_s3 }
 0x473   :  { %p753_p3 = pnand %p751_p2, %p748_p1 }
 0x475   :  { %756 = shalt.err (!%p753_p3)
}
 0x476   :  { %630 = dma.vmem_to_hbm [thread:$0]  %s628_s5, 64, %s1236_s3, [#allocation4]   ;;  %v615_v59 = vpop.permute.xlu1 %614  ;;  %v613_v0 = vpop.permute.xlu0 %612 }
 0x477   :  { %s800_s15 = smov [#allocation9]   ;;  %v616_v20 = vsel %vm601_vm10, %v613_v0, %v615_v59 }
 0x478   :  { %s637_s16 = sshll.u32 %s800_s15, 4  ;;  %v618_v21 = vsel %vm608_vm11, %v616_v20, %v592_v12  ;;  %s638_s16 = int_to_ptr.vmem [resolvable:$true] %s637_s16 }
 0x479   :  { %620 = vst [vmem:[#allocation9] sm:$0xf] %v618_v21  ;;  %s757_s17 = scalar_lea.vmem %s638_s16, 64  ;;  %p762_p5 = scmp.lt.s32.totalorder %s638_s16, %s638_s16 }
 0x47a   :  { %p758_p4 = scmp.ne.s32.totalorder %s638_s16, %s757_s17  ;;  %p763_p6 = scmp.lt.s32.totalorder %s757_s17, %s757_s17 }
 0x47c   :  { %p764_p7 = por %p763_p6, %p762_p5 }
 0x47e   :  { %p765_p8 = pnand %p764_p7, %p758_p4 }
 0x480   :  { %768 = shalt.err (!%p765_p8)
}
 0x481   :  { %s769_s3 = scalar_lea.hbm %s1237_s4, 64 }
 0x482   :  { %p770_p9 = scmp.ne.s32.totalorder %s1237_s4, %s769_s3  ;;  %p773_p10 = scmp.lt.u32.totalorder %s769_s3, %s1237_s4 }
 0x484   :  { %p775_p11 = pnand %p773_p10, %p770_p9 }
 0x486   :  { %778 = shalt.err (!%p775_p11)
}
 0x487   :  { %640 = dma.vmem_to_hbm [thread:$0]  %s638_s16, 64, %s1237_s4, [#allocation10]  }
 0x488   :  { %783 = dma.done.wait [#allocation4], 64  }
 0x489   :  { %784 = vsyncadd [#allocation4], 4294967232 }
 0x48a   :  { %785 = dma.done.wait [#allocation10], 64  }
 0x48b   :  { %786 = vsyncadd [#allocation10], 4294967232 }
 0x48c   :  { %647 = vsyncpa [#allocation3], 1 }
 0x48d   :  { %648 = vsyncpa [#allocation6], 1 }
 0x48e   :  { %649 = vsyncpa [#allocation4], 1 }
 0x48f   :  { %650 = vsyncpa [#allocation10], 1 }

</bundles_post_ra>
